<compile_context>
chip_gen: v5e
topology: v5e:2x2
jax: 0.10.0
libtpu: 0.0.40
codegen_flags: <defaults>
</compile_context>

<pallas_src>
import functools

import jax
import jax.numpy as jnp
from jax.experimental import pallas as pl
from jax.experimental.pallas import tpu as pltpu


def _build_mask_dhw(D, H, W, radius_fraction, dtype):
    """0/1 mask over (D, H, W), same math/order as the PyTorch buffer."""
    center = (D - 1) / 2.0
    radius = (D - 1) / 2.0
    thresh_sq = (radius_fraction * radius) ** 2
    i = jnp.arange(D, dtype=jnp.float32)[:, None, None]
    j = jnp.arange(H, dtype=jnp.float32)[None, :, None]
    k = jnp.arange(W, dtype=jnp.float32)[None, None, :]
    sq = (center - i) ** 2 + (center - j) ** 2 + (center - k) ** 2
    keep = sq <= jnp.float32(thresh_sq)
    return jnp.where(keep, 1.0, 0.0).astype(dtype)


def _spherical_mask_kernel(m_ref, v_ref, o_ref):
    # m_ref: (1, tn) mask row block (VMEM-resident across the inner row loop).
    # v_ref / o_ref: (tm, tn) tiles of the fused (B*C, D*H*W) view.
    o_ref[...] = v_ref[...] * m_ref[...]


def _choose_tiles(rows, cols, itemsize, target_tile_bytes, min_grid_steps):
    """Pick (tm, tn) tile sizes for the fused (rows, cols) view."""
    # dtype-native sublane packing: 8 rows for f32, 16 for bf16, 32 for int8.
    row_mult = max(8, 32 // max(1, itemsize))

    # --- column tile: full row if it fits the budget, else a multiple of 128
    #     (preferring a divisor of cols so the last block isn't ragged).
    budget_cols = max(128, target_tile_bytes // (itemsize * row_mult))
    if cols <= budget_cols:
        tn = cols
    else:
        tn = (budget_cols // 128) * 128
        t = tn
        while t >= 128:
            if cols % t == 0:
                tn = t
                break
            t -= 128

    # --- row tile: fill the per-buffer budget, aligned to row_mult.
    tm = target_tile_bytes // (itemsize * tn)
    tm = max(row_mult, (tm // row_mult) * row_mult)
    tm = min(tm, rows)

    # Prefer a tm that divides rows (avoid a ragged / masked tail block).
    if tm < rows and rows % tm != 0:
        t = (tm // row_mult) * row_mult
        while t >= row_mult:
            if rows % t == 0:
                tm = t
                break
            t -= row_mult

    def n_steps(tm_, tn_):
        return pl.cdiv(rows, tm_) * pl.cdiv(cols, tn_)

    # Keep the grid long enough for pipelining / megacore sharding.
    while n_steps(tm, tn) < min_grid_steps and tm > row_mult:
        half = max(row_mult, ((tm // 2) // row_mult) * row_mult)
        if half == tm:
            break
        tm = half
        if tm < rows and rows % tm != 0:
            t = tm
            while t >= row_mult:
                if rows % t == 0:
                    tm = t
                    break
                t -= row_mult

    # If row splitting can't produce >= 2 steps, split columns (still 128-aligned).
    while n_steps(tm, tn) < 2 and tn >= 256 and (tn // 2) % 128 == 0:
        tn //= 2

    return tm, tn


def spherical_mask_forward(volume, radius_fraction=1.0, *,
                           target_tile_bytes=2 << 20):
    """volume: (B, C, D, H, W). Returns volume * spherical_mask (features
    outside the sphere of radius radius_fraction * (D-1)/2 zeroed)."""
    B, C, D, H, W = volume.shape
    assert D == H == W, "Depth, height, width must be equal."

    rows = B * C
    cols = D * H * W
    itemsize = jnp.dtype(volume.dtype).itemsize

    tm, tn = _choose_tiles(rows, cols, itemsize, target_tile_bytes,
                           min_grid_steps=8)
    gi = pl.cdiv(rows, tm)
    gj = pl.cdiv(cols, tn)

    # Tiny precomputed mask row (the analogue of the module's registered buffer).
    mask_row = _build_mask_dhw(D, H, W, radius_fraction, volume.dtype)
    mask_row = mask_row.reshape(1, cols)

    v2 = volume.reshape(rows, cols)

    out = pl.pallas_call(
        _spherical_mask_kernel,
        out_shape=jax.ShapeDtypeStruct((rows, cols), volume.dtype),
        grid_spec=pltpu.PrefetchScalarGridSpec(
            num_scalar_prefetch=0,
            # Column axis outer / row axis inner: the (1, tn) mask block index
            # only depends on j, so it stays VMEM-resident across the inner
            # loop over row tiles (no redundant mask DMA).
            grid=(gj, gi),
            in_specs=[
                pl.BlockSpec((1, tn), lambda j, i: (0, j)),    # mask row
                pl.BlockSpec((tm, tn), lambda j, i: (i, j)),   # volume tile
            ],
            out_specs=pl.BlockSpec((tm, tn), lambda j, i: (i, j)),
        ),
        compiler_params=pltpu.CompilerParams(
            dimension_semantics=("parallel", "parallel"),
            vmem_limit_bytes=32 * 1024 * 1024,
        ),
    )(mask_row, v2)

    return out.reshape(B, C, D, H, W)


if __name__ == "__main__":
    # Small shapes consistent with the module: cubic spatial dims.
    B, C, D, H, W = 2, 4, 16, 16, 16
    radius_fraction = 0.9

    key = jax.random.PRNGKey(0)
    volume = jax.random.normal(key, (B, C, D, H, W), dtype=jnp.float32)

    out = spherical_mask_forward(volume, radius_fraction)
    out = jax.block_until_ready(out)

    # Reference check in plain JAX (same semantics as `volume * self.mask`).
    mask_dhw = _build_mask_dhw(D, H, W, radius_fraction, volume.dtype)
    mask = jnp.broadcast_to(mask_dhw[None], (C, D, H, W))
    ref = volume * mask[None]
    assert out.shape == (B, C, D, H, W)
    assert jnp.allclose(out, ref), "Pallas output mismatch vs reference"

    print("KERNEL_OK")
</pallas_src>

<mosaic_0001>
module attributes {stable_mosaic.version = 11 : i64} {
  func.func @_spherical_mask_kernel(%arg0: i32, %arg1: i32, %arg2: memref<1x2048xf32, #tpu.memory_space<vmem>>, %arg3: memref<8x2048xf32, #tpu.memory_space<vmem>>, %arg4: memref<8x2048xf32, #tpu.memory_space<vmem>>) attributes {dimension_semantics = [#tpu.dimension_semantics<parallel>, #tpu.dimension_semantics<parallel>], iteration_bounds = array<i64: 2, 1>, scalar_prefetch = 0 : i64, scratch_operands = 0 : i64, tpu.core_type = #tpu.core_type<tc>, window_params = [{transform_indices = @transform_0, window_bounds = array<i64: 1, 2048>}, {transform_indices = @transform_1, window_bounds = array<i64: 8, 2048>}, {transform_indices = @transform_2, window_bounds = array<i64: 8, 2048>}]} {
    %c0 = arith.constant 0 : index
    %c0_0 = arith.constant 0 : index
    %0 = vector.load %arg3[%c0, %c0_0] : memref<8x2048xf32, #tpu.memory_space<vmem>>, vector<8x2048xf32>
    %c0_1 = arith.constant 0 : index
    %c0_2 = arith.constant 0 : index
    %1 = vector.load %arg2[%c0_1, %c0_2] : memref<1x2048xf32, #tpu.memory_space<vmem>>, vector<1x2048xf32>
    %2 = vector.broadcast %1 : vector<1x2048xf32> to vector<8x2048xf32>
    %3 = arith.mulf %0, %2 : vector<8x2048xf32>
    %c0_3 = arith.constant 0 : index
    %c0_4 = arith.constant 0 : index
    %4 = vector.load %arg4[%c0_3, %c0_4] : memref<8x2048xf32, #tpu.memory_space<vmem>>, vector<8x2048xf32>
    tpu.vector_store %arg4[%c0_3, %c0_4], %3 {strides = array<i32>} : memref<8x2048xf32, #tpu.memory_space<vmem>>, vector<8x2048xf32>,
    return
  }
  func.func @transform_0(%arg0: i32, %arg1: i32) -> (i32, i32) {
    %c0_i32 = arith.constant 0 : i32
    %c0_i32_0 = arith.constant 0 : i32
    return %c0_i32, %arg0 : i32, i32
  }
  func.func @transform_1(%arg0: i32, %arg1: i32) -> (i32, i32) {
    %c0_i32 = arith.constant 0 : i32
    return %arg1, %arg0 : i32, i32
  }
  func.func @transform_2(%arg0: i32, %arg1: i32) -> (i32, i32) {
    %c0_i32 = arith.constant 0 : i32
    return %arg1, %arg0 : i32, i32
  }
}

</mosaic_0001>

<bundles_post_ra>
// kernel: tpu_custom_call.1
= control target key start
LH: loop header
LB: loop body
LE: loop exit
PB: predicated region body
PF: predicated region fallthrough
CT: control target
= control target key end

     0   :  { %7 = vsyncpa [#allocation3], 0  ;;  %s857_s0 = inlined_call_operand.hbm [shape: f32[1,4096], index: 0, kind: input, shape index: {}]   ;;  %s858_s1 = inlined_call_operand.hbm [shape: f32[8,4096], index: 1, kind: input, shape index: {}]   ;;  %s859_s2 = inlined_call_operand.hbm [shape: f32[8,4096], index: 2, kind: output, shape index: {}]  }
   0x1   :  { %9 = vsyncpa [#allocation3 + $0x1], 0 }
   0x2   :  { %10 = vsyncpa [#allocation6], 0 }
   0x3   :  { %12 = vsyncpa [#allocation6 + $0x1], 0 }
   0x4   :  { %13 = vsyncpa [#allocation4], 0 }
   0x5   :  { %15 = vsyncpa [#allocation4 + $0x1], 0  ;;  %s682_s9 = smov 0   ;;  %s684_s10 = smov 0  }
   0x6   :  { %s686_s11 = smov 0   ;;  %s688_s12 = smov 0  }
   0x7   :  { %s690_s13 = smov 0   ;;  %s692_s14 = smov 0  }
   0x8 LB: > { %s432_s15 = sadd.s32 4294967295, %s665_s14   ;;  %s433_s16 = sadd.s32 4294967294, %s665_s14   ;;  %s665_s14 = sphi %s692_s14, %s21_s14   ;;  %s661_s13 = sphi %s690_s13, %s869_s13   ;;  %s657_s12 = sphi %s688_s12, %s868_s12   ;;  %s653_s11 = sphi %s686_s11, %s867_s11   ;;  %s649_s10 = sphi %s684_s10, %s866_s10   ;;  %s645_s9 = sphi %s682_s9, %s865_s9  }
   0x9   : > { %s33_s17 = sadd.s32 1, %s661_s13  ;;  %s40_s18 = sadd.s32 1, %s653_s11 }
   0xa   : > { %p35_p0 = scmp.ge.s32.totalorder %s33_s17, 2  ;;  %p47_p1 = scmp.ne.s32.totalorder %s653_s11, %s649_s10 }
   0xb   : > { %p48_p2 = scmp.eq.s32.totalorder %s665_s14, 0  ;;  %p53_p3 = scmp.ne.s32.totalorder %s649_s10, %s645_s9 }
   0xc   : > { %s871_s17 = smov (%p35_p0, %s33_s17), 0  ;;  %p54_p5 = scmp.eq.s32.totalorder %s432_s15, 0 }
   0xd   : > { %p723_p4 = por %p48_p2, %p47_p1  ;;  %s37_s20 = ssub.s32 %s661_s13, %s871_s17 }
   0xe   : > { %p107_p6 = scmp.eq.s32.totalorder %s432_s15, 1  ;;  %p38_p7 = scmp.eq.s32.totalorder %s37_s20, 0 }
   0xf   : > { %p729_p8 = por %p54_p5, %p53_p3  ;;  %p113_p10 = scmp.eq.s32.totalorder %s433_s16, 1 }
  0x10   : > { %p733_p9 = por %p107_p6, %p47_p1  ;;  %p435_p12 = scmp.ge.s32.totalorder %s665_s14, 2 }
  0x11   : > { %s738_s23 = scalar_select %p38_p7, %s653_s11, %s40_s18  }
  0x12   : > { %p740_p11 = por %p113_p10, %p53_p3  ;;  %p469_p13 = scmp.lt.s32.totalorder %s665_s14, 2 }
  0x13   : > { %s133_s25 = sand.u32 1, %s653_s11   ;;  %s437_s27 = sshll.u32 %s661_s13, 4 }
  0x14   : > { %s436_s26 = sshll.u32 %s133_s25, 4  ;;  %s141_s30 = scalar_lea.hbm %s857_s0, %s437_s27 }
  0x15   : > { %s137_s3 = scalar_lea.vmem [#allocation2], %s436_s26  ;;  %s143_s5 = sshll.u32 %s141_s30, 4  ;;  %s144_s5 = int_to_ptr.hbm [resolvable:$true] %s143_s5 }
  0x16   : > { %s145_s4 = sshll.u32 %s137_s3, 4  ;;  %p753_p0 = pnand %p469_p13, %p723_p4  ;;  %s146_s4 = int_to_ptr.vmem [resolvable:$true] %s145_s4 }
  0x17   : > { %p441_p1 = scmp.ge.s32.totalorder %s665_s14, 1  ;;  %p172_p2 = scmp.lt.s32.totalorder %s665_s14, 3 }
  0x18   : > { %s134_s7 = scalar_lea.sflag [#allocation3], %s133_s25  ;;  %s438_s8 = sshll.u32 %s133_s25, 7 }
  0x19   : > { %461 = dma.hbm_to_vmem [thread:$0]  (!%p753_p0), %s144_s5, 256, %s146_s4, %s134_s7  }
  0x1a   : > { %p173_p3 = pnand %p441_p1, %p172_p2  ;;  %s450_s15 = sshll.u32 %s661_s13, 7 }
  0x1b   : > { %s163_s20 = scalar_lea.hbm %s858_s1, %s450_s15  ;;  %s156_s26 = scalar_lea.vmem [#allocation5], %s438_s8 }
  0x1c   : > { %s167_s19 = sshll.u32 %s156_s26, 4  ;;  %s165_s27 = sshll.u32 %s163_s20, 4  ;;  %s168_s19 = int_to_ptr.vmem [resolvable:$true] %s167_s19  ;;  %s166_s27 = int_to_ptr.hbm [resolvable:$true] %s165_s27 }
  0x1d   : > { %s153_s28 = scalar_lea.sflag [#allocation6], %s133_s25  ;;  %176 = sbr.rel (%p173_p3) target bundleno = 62 (0x3e), region = 28 }
  0x1e   : > { %464 = dma.hbm_to_vmem [thread:$0]  (!%p753_p0), %s166_s27, 2048, %s168_s19, %s153_s28  }
  0x1f   : > { %s768_s29 = sand.u32 (!%p173_p3), 1, %s649_s10  }
  0x20   : > { %s442_s30 = sshll.u32 (!%p173_p3), %s768_s29, 4  ;;  %s179_s3 = scalar_lea.sflag (!%p173_p3), [#allocation3], %s768_s29 }
  0x21   : > { %s182_s4 = scalar_lea.vmem (!%p173_p3), [#allocation2], %s442_s30 }
  0x22   : > { %632 = dma.done.wait (%p729_p8), %s179_s3, 256  }
  0x23   : > { %634 = vsyncadd (%p729_p8), %s179_s3, 4294967040  ;;  %s443_s25 = sshll.u32 %s768_s29, 7  ;;  %s189_s5 = scalar_lea.sflag [#allocation6], %s768_s29 }
  0x24   : > { %s778_s6 = scalar_lea.vmem [#allocation5], %s443_s25 }
  0x25   : > { %636 = dma.done.wait (%p729_p8), %s189_s5, 2048  }
  0x26   : > { %638 = vsyncadd (%p729_p8), %s189_s5, 4294965248  ;;  %v222_v0 = vld [vmem:[%s778_s6] sm:$0xff]  ;;  %v223_v2 = vld [vmem:[%s778_s6 + $0x8] sm:$0xff]  ;;  %s791_s21 = scalar_lea.vmem [#allocation7], %s443_s25  ;;  %s451_s7 = sshll.u32 %s657_s12, 7 }
  0x27   : > { %v238_v1 = vld [vmem:[%s182_s4] sm:$0xff]  ;;  %v225_v7 = vld [vmem:[%s778_s6 + $0x18] sm:$0xff]  ;;  %v227_v15 = vld [vmem:[%s778_s6 + $0x28] sm:$0xff]  ;;  %s320_s15 = scalar_lea.hbm %s859_s2, %s451_s7  ;;  %s322_s16 = sshll.u32 %s791_s21, 4  ;;  %s323_s16 = int_to_ptr.vmem [resolvable:$true] %s322_s16 }
  0x28   : > { %v242_v3 = vperm.slane %v238_v1, 0  ;;  %v243_v4 = vperm.slane %v238_v1, 1  ;;  %v224_v5 = vld [vmem:[%s778_s6 + $0x10] sm:$0xff]  ;;  %v244_v6 = vperm.slane %v238_v1, 2  ;;  %v245_v8 = vperm.slane %v238_v1, 3  ;;  %v226_v9 = vld [vmem:[%s778_s6 + $0x20] sm:$0xff] }
  0x29   : > { %v246_v10 = vperm.slane %v238_v1, 4  ;;  %v247_v11 = vperm.slane %v238_v1, 5  ;;  %v248_v16 = vperm.slane %v238_v1, 6  ;;  %v239_v17 = vld [vmem:[%s182_s4 + $0x8] sm:$0xff]  ;;  %v228_v19 = vld [vmem:[%s778_s6 + $0x30] sm:$0xff]  ;;  %v249_v20 = vperm.slane %v238_v1, 7 }
  0x2a   : > { %v274_v12 = vmul.f32 %v242_v3, %v222_v0  ;;  %v275_v13 = vmul.f32 %v243_v4, %v223_v2  ;;  %v276_v14 = vmul.f32 %v244_v6, %v224_v5  ;;  %v277_v18 = vmul.f32 %v245_v8, %v225_v7  ;;  %v229_v22 = vld [vmem:[%s778_s6 + $0x38] sm:$0xff]  ;;  %v230_v25 = vld [vmem:[%s778_s6 + $0x40] sm:$0xff]  ;;  %v231_v28 = vld [vmem:[%s778_s6 + $0x48] sm:$0xff]  ;;  %s324_s18 = sshll.u32 %s320_s15, 4  ;;  %s307_s20 = scalar_lea.sflag [#allocation4], %s768_s29  ;;  %s325_s18 = int_to_ptr.hbm [resolvable:$true] %s324_s18 }
  0x2b   : > { %v278_v21 = vmul.f32 %v246_v10, %v226_v9  ;;  %v250_v23 = vperm.slane %v239_v17, 0  ;;  %v279_v24 = vmul.f32 %v247_v11, %v227_v15  ;;  %v251_v26 = vperm.slane %v239_v17, 1  ;;  %v232_v31 = vld [vmem:[%s778_s6 + $0x50] sm:$0xff]  ;;  %v233_v34 = vld [vmem:[%s778_s6 + $0x58] sm:$0xff]  ;;  %v234_v37 = vld [vmem:[%s778_s6 + $0x60] sm:$0xff]  ;;  %s593_s26 = sshra.s32 %s325_s18, 4  ;;  %s594_s26 = int_to_ptr.hbm [resolvable:$true] %s593_s26 }
  0x2c   : > { %290 = vst [vmem:[%s791_s21] sm:$0xff] %v274_v12  ;;  %v280_v27 = vmul.f32 %v248_v16, %v228_v19  ;;  %v252_v29 = vperm.slane %v239_v17, 2  ;;  %v281_v30 = vmul.f32 %v249_v20, %v229_v22  ;;  %v253_v32 = vperm.slane %v239_v17, 3  ;;  %v235_v40 = vld [vmem:[%s778_s6 + $0x68] sm:$0xff]  ;;  %v236_v43 = vld [vmem:[%s778_s6 + $0x70] sm:$0xff]  ;;  %v237_v46 = vld [vmem:[%s778_s6 + $0x78] sm:$0xff]  ;;  %s595_s19 = scalar_lea.hbm %s594_s26, 128  ;;  %p600_p7 = scmp.lt.s32.totalorder %s594_s26, %s859_s2 }
  0x2d   : > { %291 = vst [vmem:[%s791_s21 + $0x8] sm:$0xff] %v275_v13  ;;  %v282_v33 = vmul.f32 %v250_v23, %v230_v25  ;;  %v254_v35 = vperm.slane %v239_v17, 4  ;;  %v283_v36 = vmul.f32 %v251_v26, %v231_v28  ;;  %v255_v38 = vperm.slane %v239_v17, 5  ;;  %p596_p4 = scmp.ne.s32.totalorder %s594_s26, %s595_s19  ;;  %s599_s30 = scalar_lea.hbm %s859_s2, 256 }
  0x2e   : > { %292 = vst [vmem:[%s791_s21 + $0x10] sm:$0xff] %v276_v14  ;;  %v284_v39 = vmul.f32 %v252_v29, %v232_v31  ;;  %v256_v41 = vperm.slane %v239_v17, 6  ;;  %v285_v42 = vmul.f32 %v253_v32, %v233_v34  ;;  %v257_v44 = vperm.slane %v239_v17, 7  ;;  %p601_p8 = scmp.lt.s32.totalorder %s599_s30, %s595_s19 }
  0x2f   : > { %293 = vst [vmem:[%s791_s21 + $0x18] sm:$0xff] %v277_v18  ;;  %v286_v45 = vmul.f32 %v254_v35, %v234_v37  ;;  %v287_v47 = vmul.f32 %v255_v38, %v235_v40  ;;  %p597_p5 = pnand %p596_p4, %p733_p9 }
  0x30   : > { %294 = vst [vmem:[%s791_s21 + $0x20] sm:$0xff] %v278_v21  ;;  %v288_v48 = vmul.f32 %v256_v41, %v236_v43  ;;  %v289_v49 = vmul.f32 %v257_v44, %v237_v46  ;;  %p602_p10 = por %p601_p8, %p600_p7 }
  0x31   : > { %295 = vst [vmem:[%s791_s21 + $0x28] sm:$0xff] %v279_v24  ;;  %p598_p6 = pneg %p597_p5 }
  0x32   : > { %296 = vst [vmem:[%s791_s21 + $0x30] sm:$0xff] %v280_v27 }
  0x33   : > { %297 = vst [vmem:[%s791_s21 + $0x38] sm:$0xff] %v281_v30  ;;  %p603_p13 = pnand %p602_p10, %p598_p6 }
  0x34   : > { %298 = vst [vmem:[%s791_s21 + $0x40] sm:$0xff] %v282_v33 }
  0x35   : > { %299 = vst [vmem:[%s791_s21 + $0x48] sm:$0xff] %v283_v36 }
  0x36   : > { %300 = vst [vmem:[%s791_s21 + $0x50] sm:$0xff] %v284_v39 }
  0x37   : > { %301 = vst [vmem:[%s791_s21 + $0x58] sm:$0xff] %v285_v42 }
  0x38   : > { %302 = vst [vmem:[%s791_s21 + $0x60] sm:$0xff] %v286_v45 }
  0x39   : > { %303 = vst [vmem:[%s791_s21 + $0x68] sm:$0xff] %v287_v47 }
  0x3a   : > { %304 = vst [vmem:[%s791_s21 + $0x70] sm:$0xff] %v288_v48 }
  0x3b   : > { %305 = vst [vmem:[%s791_s21 + $0x78] sm:$0xff] %v289_v49 }
  0x3c   : > { %606 = shalt.err (!%p603_p13)
}
  0x3d   : > { %456 = dma.vmem_to_hbm [thread:$0]  (%p733_p9), %s323_s16, 2048, %s325_s18, %s307_s20  }
  0x3e PF: > { %s336_s29 = sand.u32 1, %s645_s9   ;;  %p466_p0 = pnand %p435_p12, %p740_p11 }
  0x3f   : > { %s337_s25 = scalar_lea.sflag [#allocation4], %s336_s29 }
  0x40   : > { %p467_p1 = pneg %p466_p0 }
  0x42   : > { %640 = dma.done.wait (%p467_p1), %s337_s25, 2048  }
  0x43   : > { %642 = vsyncadd (%p467_p1), %s337_s25, 4294965248  ;;  %s21_s14 = sadd.s32 1, %s665_s14   ;;  %s865_s9 = smov %s649_s10 }
  0x44   : > { %p18_p2 = scmp.ge.s32.totalorder %s21_s14, 4   ;;  %s866_s10 = smov %s653_s11 }
  0x45   : > { %s867_s11 = smov %s738_s23  ;;  %s868_s12 = smov %s661_s13 }
  0x46   : > { %s869_s13 = smov %s871_s17  ;;  %20 = sbr.rel (!%p18_p2) target bundleno = 8 (0x8), region = 86 }
  0x4b   :  { %343 = vsyncpa [#allocation3], 1 }
  0x4c   :  { %345 = vsyncpa [#allocation3 + $0x1], 1 }
  0x4d   :  { %346 = vsyncpa [#allocation6], 1 }
  0x4e   :  { %348 = vsyncpa [#allocation6 + $0x1], 1 }
  0x4f   :  { %349 = vsyncpa [#allocation4], 1 }
  0x50   :  { %351 = vsyncpa [#allocation4 + $0x1], 1 }

</bundles_post_ra>
